<compile_context>
chip_gen: v5e
topology: v5e:2x2
jax: 0.10.0
libtpu: 0.0.40
codegen_flags: <defaults>
</compile_context>

<pallas_src>
import functools

import numpy as np
import jax
import jax.numpy as jnp
from jax import lax
from jax.experimental import pallas as pl
from jax.experimental.pallas import tpu as pltpu

# ----------------------------- module constants ------------------------------
MAX_DETECTION = 100
LANE_K = 128                       # detections kept lane-dense (>= MAX_DETECTION)
SCORE_THRESHOLD = 0.1
PC_RANGE = (-45.0, 0.0, -5.0, 45.0, 90.0, 5.0)
BEV_MAP_SIZE = (256, 256)
ORIEN_BIN_SIZE = 4
ALPHA_CENTERS = (0.0, np.pi / 2.0, np.pi, -np.pi / 2.0)
DIM_MEAN = ((3.884, 1.5261, 1.6286),
            (0.8423, 1.7607, 0.6602),
            (1.7635, 1.7372, 0.5968))
REG_CHANNELS = 22                  # 2 reg + 1 z + 3 dim + 16 ori
# dim_modes = ['exp', False]  -> dims = exp(offset) * mean[cls]   (std unused)

# Channel order presented to the decode kernel (sublane rows of the input slab):
#   0-1 reg xy | 2 z | 3-5 dim offsets |
#   6-9 ori bin cls0 logits | 10-13 cls1 logits | 14-17 sin | 18-21 cos |
#   22 xs | 23 ys | 24-26 per-class dim_mean (gathered in the wrapper)
_CH_ORDER = np.array([0, 1, 2, 3, 4, 5,
                      6, 8, 10, 12,        # cls0 logits, bins 0..3
                      7, 9, 11, 13,        # cls1 logits
                      14, 16, 18, 20,      # sin offsets
                      15, 17, 19, 21],     # cos offsets
                     dtype=np.int32)
SLAB_ROWS = REG_CHANNELS + 5       # 27
OUT_ROWS = 9                       # 6 box rows + sin + cos + alpha_center

_SX = (PC_RANGE[3] - PC_RANGE[0]) / float(BEV_MAP_SIZE[0])
_SY = (PC_RANGE[4] - PC_RANGE[1]) / float(BEV_MAP_SIZE[1])


# =============================== Pallas kernel 1 ==============================
# nms_hm: 3x3 max pool (stride 1, implicit -inf padding); keep = (hmax == heat)
def _nms_kernel(x_ref, o_ref, *, plane_h):
    """Single-block NMS over a (B*C*H, W) slab (flattened class/batch planes).

    Neighbor shifts are XLU rotates over the whole slab; iota-derived edge
    masks (row mod plane_h) stop values leaking between stacked planes and
    across image borders.
    """
    x = x_ref[...]                                    # (R, W)
    rows, width = x.shape
    neg = jnp.float32(-jnp.inf)
    row = lax.broadcasted_iota(jnp.int32, (rows, width), 0)
    col = lax.broadcasted_iota(jnp.int32, (rows, width), 1)
    if plane_h & (plane_h - 1) == 0:                  # power-of-two fast path
        rmod = row & (plane_h - 1)
    else:
        rmod = row % plane_h
    # vertical 3-max via sublane rotates + per-plane edge masks
    below = jnp.where(rmod == plane_h - 1, neg, pltpu.roll(x, rows - 1, 0))  # x[i+1, j]
    above = jnp.where(rmod == 0, neg, pltpu.roll(x, 1, 0))                   # x[i-1, j]
    vmax = jnp.maximum(jnp.maximum(below, above), x)
    # horizontal 3-max via lane rotates + edge masks
    right = jnp.where(col == width - 1, neg, pltpu.roll(vmax, width - 1, 1))  # [i, j+1]
    left = jnp.where(col == 0, neg, pltpu.roll(vmax, 1, 1))                   # [i, j-1]
    hmax = jnp.maximum(jnp.maximum(right, left), vmax)
    o_ref[...] = jnp.where(hmax == x, x, jnp.float32(0.0))


def nms_hm(heat):
    """CenterNet NMS.  Gridless single-block pallas_call (one DMA each way).

    VMEM note: needs ~2 * B*C*H*W*4 bytes resident; at realistic BEV sizes
    (3 x 256 x 256 f32 ~ 0.75 MiB per batch) this is far below even v7x's
    64 MiB.  For v7x a (B*C,) "parallel" grid variant would feed both TCs.
    """
    B, C, H, W = heat.shape
    x2d = heat.reshape(B * C * H, W)
    out = pl.pallas_call(
        functools.partial(_nms_kernel, plane_h=H),
        out_shape=jax.ShapeDtypeStruct(x2d.shape, x2d.dtype),
        in_specs=[pl.BlockSpec(memory_space=pltpu.MemorySpace.VMEM)],
        out_specs=pl.BlockSpec(memory_space=pltpu.MemorySpace.VMEM),
    )(x2d)
    return out.reshape(B, C, H, W)


# =============================== Pallas kernel 2 ==============================
# Per-detection decode, fully lane-dense: detections (batch*K) on the lane
# axis, channels on the sublane axis (_CH_ORDER above).
def _decode_kernel(f_ref, o_ref):
    # f_ref: (27, L) input slab.  o_ref: (9, L) -- rows 0-5 = final_box_preds
    # [d1, d2, d0, x, z, y], rows 6-8 = [sin, cos, alpha_center].

    # decode_dimension: dims = exp(offset) * dim_mean[cls] (mean pre-gathered)
    dims = jnp.exp(f_ref[3:6, :]) * f_ref[24:27, :]                     # (3, L)

    xs = f_ref[22:23, :] + f_ref[0:1, :]                                # + reg x
    ys = f_ref[23:24, :] + f_ref[1:2, :]                                # + reg y
    z = f_ref[2:3, :] + dims[1:2, :] * jnp.float32(0.5)                 # pre-roll dim[1]
    xs = xs * jnp.float32(_SX) + jnp.float32(PC_RANGE[0])
    ys = (jnp.float32(BEV_MAP_SIZE[1]) - ys) * jnp.float32(_SY) + jnp.float32(PC_RANGE[1])

    # Orientation bin: argmax_i softmax(bin_i)[..., 1] == argmax_i (logit1-logit0)
    # (sigmoid is monotone) -> no transcendentals.  First-max tie break matches
    # torch.argmax exactly (min index among maxima).
    s = f_ref[10:14, :] - f_ref[6:10, :]                                # (4, L) block sub
    smax = jnp.max(s, axis=0, keepdims=True)                            # XLU sublane reduce
    bidx = lax.broadcasted_iota(jnp.int32, s.shape, 0)
    first = jnp.min(jnp.where(s == smax, bidx, ORIEN_BIN_SIZE),
                    axis=0, keepdims=True)                              # (1, L)
    onehot = bidx == first                                              # (4, L)
    sin_s = jnp.sum(jnp.where(onehot, f_ref[14:18, :], 0.0), axis=0, keepdims=True)
    cos_s = jnp.sum(jnp.where(onehot, f_ref[18:22, :], 0.0), axis=0, keepdims=True)
    cen_s = jnp.zeros_like(sin_s)
    for i in range(ORIEN_BIN_SIZE):                                     # 4 scalar-const selects
        cen_s = jnp.where(first == i, jnp.float32(ALPHA_CENTERS[i]), cen_s)

    # final_box_preds = cat([dim.roll(-1, dims=2), xs, z, ys]); assemble all
    # 9 rows in registers -> ONE coalesced full-block store.
    o_ref[...] = jnp.concatenate(
        [dims[1:2, :], dims[2:3, :], dims[0:1, :], xs, z, ys, sin_s, cos_s, cen_s],
        axis=0)


def _decode_call(slab):
    rows, lanes = slab.shape
    return pl.pallas_call(
        _decode_kernel,
        out_shape=jax.ShapeDtypeStruct((OUT_ROWS, lanes), jnp.float32),
        in_specs=[pl.BlockSpec(memory_space=pltpu.MemorySpace.VMEM)],
        out_specs=pl.BlockSpec(memory_space=pltpu.MemorySpace.VMEM),
    )(slab)


# ================================ JAX glue ===================================
def _gather_channels_nchw(feat, inds):
    # feat: (B, C, H, W), inds: (B, K) flat spatial index -> (B, C, K)
    # Gather directly in NCHW (no full NHWC transpose pass over det_reg).
    B, C, H, W = feat.shape
    flat = feat.reshape(B, C, H * W)
    idx = jnp.broadcast_to(inds[:, None, :], (B, C, inds.shape[1]))
    return jnp.take_along_axis(flat, idx, axis=2)


def _topk(scores, K):
    B, C, H, W = scores.shape
    topk_scores, topk_inds = lax.top_k(scores.reshape(B, C, H * W), K)
    topk_inds = topk_inds % (H * W)
    topk_ys = (topk_inds // W).astype(jnp.float32)
    topk_xs = (topk_inds % W).astype(jnp.float32)
    topk_score, topk_ind = lax.top_k(topk_scores.reshape(B, C * K), K)
    topk_clses = topk_ind // K

    def g(a):
        return jnp.take_along_axis(a.reshape(B, C * K), topk_ind, axis=1)

    return topk_score, g(topk_inds), topk_clses, g(topk_ys), g(topk_xs)


def _wrap_pi(a):
    gt = (a > np.pi).astype(a.dtype)
    lt = (a < -np.pi).astype(a.dtype)
    return a - 2.0 * np.pi * gt + 2.0 * np.pi * lt


@jax.jit
def det_infer_device(det_cls, det_reg):
    B = det_cls.shape[0]
    pred_map = nms_hm(det_cls)                                  # Pallas kernel 1

    # top_k directly at the 128-lane width: same top-100 set, no pad copies.
    scores, inds, clses, ys, xs = _topk(pred_map, LANE_K)

    feat = _gather_channels_nchw(det_reg, inds)                 # (B, 22, 128)
    feat = feat[:, _CH_ORDER, :]                                # group ori channels
    mean = jnp.asarray(DIM_MEAN, jnp.float32)[clses]            # (B, 128, 3) per-class mean
    aux = jnp.concatenate(
        [xs[:, None, :], ys[:, None, :], jnp.transpose(mean, (0, 2, 1))], axis=1)
    slab = jnp.concatenate([feat, aux], axis=1)                 # (B, 27, 128)
    slab = jnp.transpose(slab, (1, 0, 2)).reshape(SLAB_ROWS, B * LANE_K)

    dec = _decode_call(slab).reshape(OUT_ROWS, B, LANE_K)       # Pallas kernel 2

    boxes = jnp.transpose(dec[0:6], (1, 2, 0))                  # (B, 128, 6)

    # TODO(synk): arctan2 has no guaranteed Mosaic lowering -> tiny epilogue in plain JAX.
    orientations = jnp.arctan2(dec[6], dec[7]) + dec[8]
    # rays = atan2(boxes[:, -3], boxes[:, -1]) = atan2(x_bev, y_bev); the
    # reference's "z" variable is final_box_preds[..., -1] (== ys) there.
    rays = jnp.arctan2(dec[3], dec[5])
    rotys = _wrap_pi(orientations + rays)
    alphas = _wrap_pi(orientations)

    # Pack everything into one slab -> single device->host transfer.
    packed = jnp.concatenate(
        [clses.astype(jnp.float32)[..., None], alphas[..., None], boxes,
         rotys[..., None], scores[..., None]], axis=2)          # (B, 128, 10)
    return packed[:, :MAX_DETECTION, :]                         # (B, 100, 10)


def det_infer_forward(det_cls, det_reg):
    packed = np.asarray(jax.block_until_ready(det_infer_device(det_cls, det_reg)))

    # TODO(synk): dynamic-shape score-threshold filtering + per-batch concat done
    # host-side (the original per-batch loop is only well-defined for batch == 1).
    results = []
    for i in range(packed.shape[0]):
        p = packed[i]
        m = p[:, 9] > SCORE_THRESHOLD
        p = p[m]
        n = p.shape[0]
        boxes2d = np.ones((n, 4), np.float32)
        boxes2d[:, 3] = 100.0
        # columns: [label, alpha, boxes2d(4), box(6), roty, score]
        results.append(np.concatenate([p[:, 0:2], boxes2d, p[:, 2:10]], axis=1))
    return np.concatenate(results, axis=0) if results else None


# ================================== main =====================================
if __name__ == "__main__":
    key = jax.random.PRNGKey(0)
    k1, k2 = jax.random.split(key)

    B, NUM_CLS, H, W = 2, 3, 32, 128          # 3 classes (matches dim_mean rows)
    det_cls = jax.nn.sigmoid(jax.random.normal(k1, (B, NUM_CLS, H, W), jnp.float32))
    det_reg = 0.1 * jax.random.normal(k2, (B, REG_CHANNELS, H, W), jnp.float32)

    # --- NMS kernel correctness check vs. an XLA reduce_window reference -----
    nms_out = jax.block_until_ready(jax.jit(nms_hm)(det_cls))
    hmax_ref = lax.reduce_window(det_cls, -jnp.inf, lax.max,
                                 (1, 1, 3, 3), (1, 1, 1, 1), "SAME")
    nms_ref = jnp.where(hmax_ref == det_cls, det_cls, 0.0)
    np.testing.assert_allclose(np.asarray(nms_out), np.asarray(nms_ref),
                               rtol=0.0, atol=1e-6)

    # --- full forward pass ----------------------------------------------------
    result = det_infer_forward(det_cls, det_reg)
    assert result is not None and result.ndim == 2 and result.shape[1] == 14
    assert np.all(np.isfinite(result))
    assert np.all(np.abs(result[:, 1]) <= np.pi + 1e-5)   # alpha wrapped to (-pi, pi]
    print("KERNEL_OK")
</pallas_src>

<mosaic_0001>
module attributes {stable_mosaic.version = 11 : i64} {
  func.func @_nms_kernel(%arg0: memref<192x128xf32, #tpu.memory_space<vmem>>, %arg1: memref<192x128xf32, #tpu.memory_space<vmem>>) attributes {dimension_semantics = [], scalar_prefetch = 0 : i64, scratch_operands = 0 : i64, tpu.core_type = #tpu.core_type<tc>} {
    %c0 = arith.constant 0 : index
    %c0_0 = arith.constant 0 : index
    %0 = vector.load %arg0[%c0, %c0_0] : memref<192x128xf32, #tpu.memory_space<vmem>>, vector<192x128xf32>
    %1 = tpu.iota {dimensions = array<i32: 0>} : vector<192x128xi32>
    %2 = tpu.iota {dimensions = array<i32: 1>} : vector<192x128xi32>
    %c31_i32 = arith.constant 31 : i32
    %3 = vector.broadcast %c31_i32 : i32 to vector<192x128xi32>
    %4 = arith.andi %1, %3 : vector<192x128xi32>
    %c31_i32_1 = arith.constant 31 : i32
    %5 = vector.broadcast %c31_i32_1 : i32 to vector<192x128xi32>
    %6 = arith.cmpi eq, %4, %5 : vector<192x128xi32>
    %c191_i32 = arith.constant 191 : i32
    %7 = tpu.dynamic_rotate %0 by %c191_i32 dim 0 : vector<192x128xf32>, i32 -> vector<192x128xf32>
    %cst = arith.constant 0xFF800000 : f32
    %8 = vector.broadcast %cst : f32 to vector<192x128xf32>
    %9 = arith.select %6, %8, %7 : vector<192x128xi1>, vector<192x128xf32>
    %c0_i32 = arith.constant 0 : i32
    %10 = vector.broadcast %c0_i32 : i32 to vector<192x128xi32>
    %11 = arith.cmpi eq, %4, %10 : vector<192x128xi32>
    %c1_i32 = arith.constant 1 : i32
    %12 = tpu.dynamic_rotate %0 by %c1_i32 dim 0 : vector<192x128xf32>, i32 -> vector<192x128xf32>
    %cst_2 = arith.constant 0xFF800000 : f32
    %13 = vector.broadcast %cst_2 : f32 to vector<192x128xf32>
    %14 = arith.select %11, %13, %12 : vector<192x128xi1>, vector<192x128xf32>
    %15 = arith.maximumf %9, %14 : vector<192x128xf32>
    %16 = arith.maximumf %15, %0 : vector<192x128xf32>
    %c127_i32 = arith.constant 127 : i32
    %17 = vector.broadcast %c127_i32 : i32 to vector<192x128xi32>
    %18 = arith.cmpi eq, %2, %17 : vector<192x128xi32>
    %c127_i32_3 = arith.constant 127 : i32
    %19 = tpu.dynamic_rotate %16 by %c127_i32_3 dim 1 : vector<192x128xf32>, i32 -> vector<192x128xf32>
    %cst_4 = arith.constant 0xFF800000 : f32
    %20 = vector.broadcast %cst_4 : f32 to vector<192x128xf32>
    %21 = arith.select %18, %20, %19 : vector<192x128xi1>, vector<192x128xf32>
    %c0_i32_5 = arith.constant 0 : i32
    %22 = vector.broadcast %c0_i32_5 : i32 to vector<192x128xi32>
    %23 = arith.cmpi eq, %2, %22 : vector<192x128xi32>
    %c1_i32_6 = arith.constant 1 : i32
    %24 = tpu.dynamic_rotate %16 by %c1_i32_6 dim 1 : vector<192x128xf32>, i32 -> vector<192x128xf32>
    %cst_7 = arith.constant 0xFF800000 : f32
    %25 = vector.broadcast %cst_7 : f32 to vector<192x128xf32>
    %26 = arith.select %23, %25, %24 : vector<192x128xi1>, vector<192x128xf32>
    %27 = arith.maximumf %21, %26 : vector<192x128xf32>
    %28 = arith.maximumf %27, %16 : vector<192x128xf32>
    %29 = arith.cmpf oeq, %28, %0 : vector<192x128xf32>
    %cst_8 = arith.constant 0.000000e+00 : f32
    %30 = vector.broadcast %cst_8 : f32 to vector<192x128xf32>
    %31 = arith.select %29, %0, %30 : vector<192x128xi1>, vector<192x128xf32>
    %c0_9 = arith.constant 0 : index
    %c0_10 = arith.constant 0 : index
    %32 = vector.load %arg1[%c0_9, %c0_10] : memref<192x128xf32, #tpu.memory_space<vmem>>, vector<192x128xf32>
    tpu.vector_store %arg1[%c0_9, %c0_10], %31 {strides = array<i32>} : memref<192x128xf32, #tpu.memory_space<vmem>>, vector<192x128xf32>,
    return
  }
}

</mosaic_0001>

<bundles_post_ra>
// kernel: nms_hm.1
= control target key start
LH: loop header
LB: loop body
LE: loop exit
PB: predicated region body
PF: predicated region fallthrough
CT: control target
= control target key end

     0   :  { %6 = vsyncpa [#allocation3], 0  ;;  %s1371_s0 = inlined_call_operand.hbm [shape: f32[192,128], index: 0, kind: input, shape index: {}]   ;;  %s1372_s1 = inlined_call_operand.hbm [shape: f32[192,128], index: 1, kind: output, shape index: {}]  }
   0x1   :  { %7 = vsyncpa [#allocation4], 0  ;;  %s12_s8 = sshll.u32 %s1371_s0, 4  ;;  %s685_s9 = smov [#allocation2]   ;;  %s13_s8 = int_to_ptr.hbm [resolvable:$true] %s12_s8 }
   0x2   :  { %s14_s10 = sshll.u32 %s685_s9, 4  ;;  %s686_s11 = smov 128   ;;  %s15_s10 = int_to_ptr.vmem [resolvable:$true] %s14_s10 }
   0x3   :  { %s687_s12 = smov 8  }
   0x4   :  { %20 = dma.hbm_to_vmem [thread:$0]  %s13_s8, 3072, %s15_s10, [#allocation3], %s686_s11, %s686_s11, %s687_s12  }
   0x5   :  { %681 = dma.done.wait [#allocation3], 3072  }
   0x6   :  { %682 = vsyncadd [#allocation3], 4294964224  ;;  %v1373_v0 = vlaneseq  ;;  %v722_v9 = vld [vmem:[#allocation2 + $0x20] sm:$0xff]  ;;  %v724_v10 = vld [vmem:[#allocation2 + $0x28] sm:$0xff]  ;;  %s688_s0 = smov 127   ;;  %s689_s13 = smov 1  }
   0x7   :  { %v726_v11 = vld [vmem:[#allocation2 + $0x30] sm:$0xff]  ;;  %v129_v15 = vrot.slane %v724_v10, 1  ;;  %v225_v17 = vrot.slane %v722_v9, 7  ;;  %v226_v18 = vrot.slane %v724_v10, 7  ;;  %v733_v19 = vld [vmem:[#allocation2 + $0x8] sm:$0xff]  ;;  %v737_v21 = vld [vmem:[#allocation2 + $0x18] sm:$0xff] }
   0x8   :  { %v708_v1 = vshrl.u32 %v1373_v0, 7  ;;  %v130_v16 = vrot.slane %v726_v11, 1  ;;  %v735_v20 = vld [vmem:[#allocation2 + $0x10] sm:$0xff]  ;;  %v222_v23 = vrot.slane %v733_v19, 7  ;;  %v742_v25 = vld [vmem:[#allocation2] sm:$0xff]  ;;  %v125_v26 = vrot.slane %v733_v19, 1 }
   0x9   :  { %v126_v22 = vrot.slane %v735_v20, 1  ;;  %v223_v24 = vrot.slane %v735_v20, 7  ;;  %v127_v29 = vrot.slane %v737_v21, 1  ;;  %v221_v30 = vrot.slane %v742_v25, 7  ;;  %v776_v44 = vld [vmem:[#allocation2 + $0x38] sm:$0xff]  ;;  %v784_v48 = vld [vmem:[#allocation2 + $0x40] sm:$0xff] }
   0xa   :  { %v54_v2 = vadd.s32 32, %v708_v1  ;;  %v53_v3 = vadd.s32 24, %v708_v1  ;;  %vm148_vm0 = vcmp.lt.s32.totalorder %v708_v1, 7  ;;  %v58_v4 = vadd.s32 64, %v708_v1  ;;  %v786_v49 = vld [vmem:[#allocation2 + $0x48] sm:$0xff]  ;;  %v811_v62 = vld [vmem:[#allocation2 + $0xb8] sm:$0xff] }
   0xb   :  { %v715_v5 = vadd.s32 56, %v708_v1  ;;  %vm245_vm1 = vcmp.lt.s32.totalorder %v708_v1, 1  ;;  %v76_v7 = vand.u32 31, %v708_v1  ;;  %v720_v8 = vadd.s32 88, %v708_v1  ;;  %s690_s14 = smov [#allocation5]   ;;  %s614_s18 = sshll.u32 %s1372_s1, 4  ;;  %s615_s18 = int_to_ptr.hbm [resolvable:$true] %s614_s18 }
   0xc   :  { %v80_v6 = vand.u32 31, %v54_v2  ;;  %v79_v12 = vand.u32 31, %v53_v3  ;;  %v84_v13 = vand.u32 31, %v58_v4  ;;  %v166_v27 = vsel %vm148_vm0, %v129_v15, %v130_v16  ;;  %s612_s15 = sshll.u32 %s690_s14, 4  ;;  %s613_s15 = int_to_ptr.vmem [resolvable:$true] %s612_s15 }
   0xd   :  { %v83_v14 = vand.u32 31, %v715_v5  ;;  %v264_v28 = vsel %vm245_vm1, %v225_v17, %v226_v18  ;;  %v267_v32 = vsel %vm245_vm1, %v222_v23, %v223_v24  ;;  %v170_v33 = vsel %vm148_vm0, %v125_v26, %v126_v22 }
   0xe   :  { %v299_v31 = vmax.f32 %v166_v27, %v264_v28  ;;  %v128_v34 = vrot.slane %v722_v9, 1  ;;  %v169_v35 = vsel %vm148_vm0, %v126_v22, %v127_v29  ;;  %v268_v36 = vsel %vm245_vm1, %v221_v30, %v222_v23  ;;  %v847_v27 = vld [vmem:[#allocation2 + $0x60] sm:$0xff] }
   0xf   :  { %vm762_vm2 = vcmp.eq.s32.totalorder %v80_v6, 0  ;;  %v224_v38 = vrot.slane %v737_v21, 7  ;;  %vm767_vm3 = vcmp.eq.s32.totalorder %v76_v7, 0  ;;  %v296_v41 = vmax.f32 %v169_v35, %v267_v32  ;;  %1403 = vst [vmem:[#allocation8_spill] sm:$0xff] %v847_v27 }
  0x10   :  { %v772_v40 = vmax.f32 %v299_v31, %v724_v10  ;;  %v295_v42 = vmax.f32 %v170_v33, %v268_v36  ;;  %v167_v43 = vsel %vm148_vm0, %v128_v34, %v129_v15  ;;  %vm103_vm4 = vcmp.eq.s32.totalorder %v79_v12, 31 }
  0x11   :  { %v265_v45 = vsel %vm245_vm1, %v224_v38, %v225_v17  ;;  %v168_v46 = vsel %vm148_vm0, %v127_v29, %v128_v34  ;;  %v266_v47 = vsel %vm245_vm1, %v223_v24, %v224_v38  ;;  %v791_v50 = vmax.f32 %v296_v41, %v735_v20  ;;  %v845_v24 = vld [vmem:[#allocation2 + $0x50] sm:$0xff] }
  0x12   :  { %353 = vrot.lane.b32.xlu2 %v772_v40, %s688_s0  ;;  %v794_v51 = vmax.f32 %v295_v42, %v733_v19  ;;  %v274_v52 = vsel %vm762_vm2, -inf, %v265_v45  ;;  %v176_v53 = vsel %vm103_vm4, -inf, %v168_v46  ;;  %v131_v56 = vrot.slane %v776_v44, 1  ;;  %v887_v46 = vld [vmem:[#allocation2 + $0x78] sm:$0xff] }
  0x13   :  { %v298_v54 = vmax.f32 %v167_v43, %v274_v52  ;;  %v297_v55 = vmax.f32 %v176_v53, %v266_v47  ;;  %v227_v57 = vrot.slane %v726_v11, 7  ;;  %347 = vrot.lane.b32.xlu1 %v791_v50, %s688_s0  ;;  %v132_v58 = vrot.slane %v784_v48, 1  ;;  %v882_v43 = vld [vmem:[#allocation2 + $0x70] sm:$0xff]  ;;  %1406 = vst [vmem:[#allocation9_spill] sm:$0xff] %v887_v46 }
  0x14   :  { %345 = vrot.lane.b32.xlu0 %v794_v51, %s688_s0  ;;  %v133_v59 = vrot.slane %v786_v49, 1  ;;  %vm806_vm5 = vcmp.eq.s32.totalorder %v84_v13, 0  ;;  %v228_v61 = vrot.slane %v776_v44, 7  ;;  %v165_v3 = vsel %vm148_vm0, %v130_v16, %v131_v56 }
  0x15   :  { %v814_v63 = vmax.f32 %v298_v54, %v722_v9  ;;  %v817_v2 = vmax.f32 %v297_v55, %v737_v21  ;;  %v263_v4 = vsel %vm245_vm1, %v226_v18, %v227_v57  ;;  %v229_v7 = vrot.slane %v784_v48, 7  ;;  %v836_v18 = vld [vmem:[#allocation2 + $0x58] sm:$0xff]  ;;  %v896_v54 = vld [vmem:[#allocation2 + $0x68] sm:$0xff] }
  0x16   :  { %v300_v5 = vmax.f32 %v165_v3, %v263_v4  ;;  %v163_v6 = vsel %vm148_vm0, %v132_v58, %v133_v59  ;;  %vm826_vm6 = vcmp.eq.s32.totalorder %v83_v14, 31  ;;  %v164_v13 = vsel %vm148_vm0, %v131_v56, %v132_v58 }
  0x17   :  { %v262_v15 = vsel %vm245_vm1, %v227_v57, %v228_v61  ;;  %v124_v16 = vrot.slane %v742_v25, 1  ;;  %v1374_v17 = vrot.slane %v811_v62, 7  ;;  %v261_v14 = vsel %vm245_vm1, %v228_v61, %v229_v7 }
  0x18   :  { %v839_v22 = vmax.f32 %v300_v5, %v726_v11  ;;  %v180_v23 = vsel %vm826_vm6, -inf, %v164_v13  ;;  %v87_v28 = vand.u32 31, %v720_v8  ;;  %v278_v29 = vsel %vm806_vm5, -inf, %v261_v14 }
  0x19   :  { %v171_v31 = vsel %vm148_vm0, %v124_v16, %v125_v26  ;;  %v269_v32 = vsel %vm245_vm1, %v1374_v17, %v221_v30  ;;  %v302_v33 = vmax.f32 %v163_v6, %v278_v29  ;;  %v135_v34 = vrot.slane %v836_v18, 1 }
  0x1a   :  { %351 = vrot.lane.b32.xlu2 %v814_v63, %s688_s0  ;;  %v270_v8 = vsel %vm767_vm3, -inf, %v269_v32  ;;  %v301_v35 = vmax.f32 %v180_v23, %v262_v15  ;;  %vm867_vm7 = vcmp.eq.s32.totalorder %v87_v28, 31  ;;  %v136_v26 = vrot.slane %v847_v27, 1 }
  0x1b   :  { %v231_v37 = vrot.slane %v845_v24, 7  ;;  %349 = vrot.lane.b32.xlu1 %v817_v2, %s688_s0  ;;  %v294_v30 = vmax.f32 %v171_v31, %v270_v8  ;;  %v232_v38 = vrot.slane %v836_v18, 7  ;;  %v134_v39 = vrot.slane %v845_v24, 1  ;;  %v936_v8 = vld [vmem:[#allocation2 + $0x80] sm:$0xff] }
  0x1c   :  { %355 = vrot.lane.b32.xlu0 %v839_v22, %s688_s0  ;;  %v230_v41 = vrot.slane %v786_v49, 7  ;;  %v160_v42 = vsel %vm148_vm0, %v135_v34, %v136_v26  ;;  %v885_v45 = vmax.f32 %v302_v33, %v784_v48  ;;  %v890_v47 = vmax.f32 %v301_v35, %v776_v44  ;;  %1409 = vst [vmem:[#allocation10_spill] sm:$0xff] %v936_v8 }
  0x1d   :  { %v184_v52 = vsel %vm867_vm7, -inf, %v160_v42  ;;  %v258_v53 = vsel %vm245_vm1, %v231_v37, %v232_v38  ;;  %v899_v55 = vmax.f32 %v294_v30, %v742_v25  ;;  %v161_v56 = vsel %vm148_vm0, %v134_v39, %v135_v34 }
  0x1e   :  { %v259_v57 = vsel %vm245_vm1, %v230_v41, %v231_v37  ;;  %v138_v58 = vrot.slane %v882_v43, 1  ;;  %v162_v60 = vsel %vm148_vm0, %v133_v59, %v134_v39  ;;  %v260_v61 = vsel %vm245_vm1, %v229_v7, %v230_v41  ;;  %v952_v39 = vld [vmem:[#allocation2 + $0x88] sm:$0xff]  ;;  %v954_v41 = vld [vmem:[#allocation2 + $0x90] sm:$0xff] }
  0x1f   :  { %v139_v3 = vrot.slane %v887_v46, 1  ;;  %v233_v4 = vrot.slane %v847_v27, 7  ;;  %v305_v5 = vmax.f32 %v184_v52, %v258_v53  ;;  %v234_v6 = vrot.slane %v896_v54, 7  ;;  %1410 = vst [vmem:[#allocation11_spill] sm:$0xff] %v954_v41 }
  0x20   :  { %v235_v12 = vrot.slane %v882_v43, 7  ;;  %v62_v13 = vadd.s32 96, %v708_v1  ;;  %v304_v15 = vmax.f32 %v161_v56, %v259_v57  ;;  %v137_v59 = vrot.slane %v896_v54, 1 }
  0x21   :  { %v303_v7 = vmax.f32 %v162_v60, %v260_v61  ;;  %v257_v23 = vsel %vm245_vm1, %v232_v38, %v233_v4  ;;  %v66_v28 = vadd.s32 128, %v708_v1  ;;  %v926_v29 = vmax.f32 %v305_v5, %v836_v18 }
  0x22   :  { %359 = vrot.lane.b32.xlu2 %v885_v45, %s688_s0  ;;  %v88_v14 = vand.u32 31, %v62_v13  ;;  %v157_v31 = vsel %vm148_vm0, %v138_v58, %v139_v3  ;;  %v255_v32 = vsel %vm245_vm1, %v234_v6, %v235_v12  ;;  %v939_v34 = vmax.f32 %v304_v15, %v845_v24 }
  0x23   :  { %357 = vrot.lane.b32.xlu1 %v890_v47, %s688_s0  ;;  %v158_v35 = vsel %vm148_vm0, %v137_v59, %v138_v58  ;;  %v256_v36 = vsel %vm245_vm1, %v233_v4, %v234_v6  ;;  %v946_v37 = vmax.f32 %v303_v7, %v786_v49  ;;  %v159_v30 = vsel %vm148_vm0, %v136_v26, %v137_v59 }
  0x24   :  { %343 = vrot.lane.b32.xlu0 %v899_v55, %s688_s0  ;;  %vm932_vm8 = vcmp.eq.s32.totalorder %v88_v14, 0  ;;  %v65_v42 = vadd.s32 120, %v708_v1  ;;  %v308_v52 = vmax.f32 %v157_v31, %v255_v32  ;;  %v237_v53 = vrot.slane %v936_v8, 7  ;;  %v979_v14 = vld [vmem:[#allocation2 + $0x98] sm:$0xff] }
  0x25   :  { %v282_v38 = vsel %vm932_vm8, -inf, %v257_v23  ;;  %v92_v56 = vand.u32 31, %v66_v28  ;;  %v236_v57 = vrot.slane %v887_v46, 7  ;;  %v307_v58 = vmax.f32 %v158_v35, %v256_v36  ;;  %1413 = vst [vmem:[#allocation12_spill] sm:$0xff] %v979_v14  ;;  %v981_v23 = vld [vmem:[#allocation2 + $0xa0] sm:$0xff] }
  0x26   :  { %v140_v26 = vrot.slane %v936_v8, 1  ;;  %v91_v60 = vand.u32 31, %v65_v42  ;;  %v306_v61 = vmax.f32 %v159_v30, %v282_v38  ;;  %v141_v4 = vrot.slane %v952_v39, 1 }
  0x27   :  { %v142_v5 = vrot.slane %v954_v41, 1  ;;  %v238_v6 = vrot.slane %v952_v39, 7  ;;  %v70_v13 = vadd.s32 160, %v708_v1  ;;  %v971_v15 = vmax.f32 %v308_v52, %v882_v43  ;;  %v1004_v52 = vld [vmem:[#allocation2 + $0xa8] sm:$0xff] }
  0x28   :  { %vm973_vm9 = vcmp.eq.s32.totalorder %v92_v56, 0  ;;  %v253_v7 = vsel %vm245_vm1, %v236_v57, %v237_v53  ;;  %v984_v28 = vmax.f32 %v307_v58, %v896_v54  ;;  %vm986_vm10 = vcmp.eq.s32.totalorder %v91_v60, 31  ;;  %1416 = vst [vmem:[#allocation13_spill] sm:$0xff] %v1004_v52 }
  0x29   :  { %v156_v32 = vsel %vm148_vm0, %v139_v3, %v140_v26  ;;  %v69_v33 = vadd.s32 152, %v708_v1  ;;  %v994_v35 = vmax.f32 %v306_v61, %v847_v27  ;;  %v154_v36 = vsel %vm148_vm0, %v141_v4, %v142_v5 }
  0x2a   :  { %365 = vrot.lane.b32.xlu2 %v926_v29, %s688_s0  ;;  %v252_v30 = vsel %vm245_vm1, %v237_v53, %v238_v6  ;;  %v155_v38 = vsel %vm148_vm0, %v140_v26, %v141_v4  ;;  %v286_v42 = vsel %vm973_vm9, -inf, %v253_v7  ;;  %v96_v3 = vand.u32 31, %v70_v13 }
  0x2b   :  { %363 = vrot.lane.b32.xlu1 %v939_v34, %s688_s0  ;;  %v240_v56 = vrot.slane %v979_v14, 7  ;;  %v241_v58 = vrot.slane %v981_v23, 7  ;;  %v188_v60 = vsel %vm986_vm10, -inf, %v156_v32  ;;  %v254_v61 = vsel %vm245_vm1, %v235_v12, %v236_v57 }
  0x2c   :  { %361 = vrot.lane.b32.xlu0 %v946_v37, %s688_s0  ;;  %v311_v53 = vmax.f32 %v154_v36, %v252_v30  ;;  %v144_v26 = vrot.slane %v981_v23, 1  ;;  %v95_v4 = vand.u32 31, %v69_v33  ;;  %v143_v59 = vrot.slane %v979_v14, 1 }
  0x2d   :  { %v310_v13 = vmax.f32 %v155_v38, %v286_v42  ;;  %v145_v7 = vrot.slane %v1004_v52, 1  ;;  %v309_v31 = vmax.f32 %v188_v60, %v254_v61  ;;  %vm1021_vm11 = vcmp.eq.s32.totalorder %v96_v3, 0 }
  0x2e   :  { %v249_v57 = vsel %vm245_vm1, %v240_v56, %v241_v58  ;;  %v73_v32 = vadd.s32 184, %v708_v1  ;;  %v239_v33 = vrot.slane %v954_v41, 7  ;;  %v1030_v36 = vmax.f32 %v311_v53, %v952_v39  ;;  %v1048_v53 = vld [vmem:[#allocation2 + $0xb0] sm:$0xff] }
  0x2f   :  { %vm1032_vm12 = vcmp.eq.s32.totalorder %v95_v4, 31  ;;  %v152_v38 = vsel %vm148_vm0, %v143_v59, %v144_v26  ;;  %v151_v42 = vsel %vm148_vm0, %v144_v26, %v145_v7  ;;  %v290_v3 = vsel %vm1021_vm11, -inf, %v249_v57  ;;  %1423 = vst [vmem:[#allocation16_spill] sm:$0xff] %v1048_v53 }
  0x30   :  { %v1043_v60 = vmax.f32 %v310_v13, %v936_v8  ;;  %v1046_v61 = vmax.f32 %v309_v31, %v887_v46  ;;  %v147_v4 = vrot.slane %v811_v62, 1  ;;  %v99_v0 = vand.u32 31, %v73_v32 }
  0x31   :  { %v192_v17 = vsel %vm1032_vm12, -inf, %v152_v38  ;;  %v250_v26 = vsel %vm245_vm1, %v239_v33, %v240_v56  ;;  %v153_v12 = vsel %vm148_vm0, %v142_v5, %v143_v59  ;;  %v251_v13 = vsel %vm245_vm1, %v238_v6, %v239_v33 }
  0x32   :  { %371 = vrot.lane.b32.xlu2 %v971_v15, %s688_s0  ;;  %1421 = vst [vmem:[#allocation14_spill] sm:$0xff] %v1043_v60  ;;  %v314_v31 = vmax.f32 %v151_v42, %v290_v3  ;;  %v243_v57 = vrot.slane %v1048_v53, 7  ;;  %v313_v32 = vmax.f32 %v192_v17, %v250_v26  ;;  %v312_v56 = vmax.f32 %v153_v12, %v251_v13 }
  0x33   :  { %369 = vrot.lane.b32.xlu1 %v984_v28, %s688_s0  ;;  %1422 = vst [vmem:[#allocation15_spill] sm:$0xff] %v1046_v61  ;;  %vm123_vm13 = vcmp.eq.s32.totalorder %v99_v0, 31  ;;  %v172_v5 = vsel %vm148_vm0, %v147_v4, %v124_v16  ;;  %v146_v6 = vrot.slane %v1048_v53, 1  ;;  %v242_v59 = vrot.slane %v1004_v52, 7 }
  0x34   :  { %367 = vrot.lane.b32.xlu0 %v994_v35, %s688_s0  ;;  %v1073_v33 = vmax.f32 %v314_v31, %v981_v23  ;;  %v196_v30 = vsel %vm123_vm13, -inf, %v172_v5  ;;  %v1424_v38 = vrot.slane %v811_v62, 7  ;;  %v1080_v0 = vmax.f32 %v313_v32, %v979_v14 }
  0x35   :  { %v1083_v42 = vmax.f32 %v312_v56, %v954_v41  ;;  %v149_v16 = vsel %vm148_vm0, %v146_v6, %v147_v4  ;;  %v247_v3 = vsel %vm245_vm1, %v242_v59, %v243_v57  ;;  %v150_v26 = vsel %vm148_vm0, %v145_v7, %v146_v6 }
  0x36   :  { %v246_v17 = vsel %vm245_vm1, %v243_v57, %v1424_v38  ;;  %1425 = vst [vmem:[#allocation17_spill] sm:$0xff] %v1080_v0  ;;  %v248_v12 = vsel %vm245_vm1, %v241_v58, %v242_v59  ;;  %v316_v4 = vmax.f32 %v149_v16, %v247_v3 }
  0x37   :  { %1426 = vst [vmem:[#allocation18_spill] sm:$0xff] %v1083_v42  ;;  %v317_v13 = vmax.f32 %v196_v30, %v246_v17  ;;  %v315_v31 = vmax.f32 %v150_v26, %v248_v12 }
  0x38   :  { %v1103_v7 = vmax.f32 %v316_v4, %v1048_v53 }
  0x39   :  { %v1100_v57 = vmax.f32 %v317_v13, %v811_v62  ;;  %v1106_v1 = vmax.f32 %v315_v31, %v1004_v52  ;;  %v1429_v52 = vlaneseq }
  0x3a   :  { %377 = vrot.lane.b32.xlu2 %v1030_v36, %s688_s0  ;;  %1427 = vst [vmem:[#allocation19_spill] sm:$0xff] %v1103_v7 }
  0x3b   :  { %375 = vrot.lane.b32.xlu1 %v1043_v60, %s688_s0  ;;  %1428 = vst [vmem:[#allocation20_spill] sm:$0xff] %v1106_v1  ;;  %v1159_v53 = vand.u32 127, %v1429_v52 }
  0x3c   :  { %373 = vrot.lane.b32.xlu0 %v1046_v61, %s688_s0 }
  0x3d   :  { %vm342_vm14 = vcmp.eq.s32.totalorder %v1159_v53, 127  ;;  %vm415_vm15 = vcmp.eq.s32.totalorder %v1159_v53, 0 }
  0x42   :  { %383 = vrot.lane.b32.xlu2 %v1073_v33, %s688_s0 }
  0x43   :  { %381 = vrot.lane.b32.xlu1 %v1080_v0, %s688_s0 }
  0x44   :  { %379 = vrot.lane.b32.xlu0 %v1083_v42, %s688_s0 }
  0x4a   :  { %389 = vrot.lane.b32.xlu2 %v1100_v57, %s688_s0 }
  0x4b   :  { %387 = vrot.lane.b32.xlu1 %v1103_v7, %s688_s0 }
  0x4c   :  { %385 = vrot.lane.b32.xlu0 %v1106_v1, %s688_s0 }
  0x52   :  { %420 = vrot.lane.b32.xlu2 %v791_v50, %s689_s13 }
  0x53   :  { %418 = vrot.lane.b32.xlu1 %v794_v51, %s689_s13 }
  0x54   :  { %416 = vrot.lane.b32.xlu0 %v899_v55, %s689_s13 }
  0x5a   :  { %426 = vrot.lane.b32.xlu2 %v772_v40, %s689_s13 }
  0x5b   :  { %424 = vrot.lane.b32.xlu1 %v814_v63, %s689_s13 }
  0x5c   :  { %422 = vrot.lane.b32.xlu0 %v817_v2, %s689_s13 }
  0x62   :  { %432 = vrot.lane.b32.xlu2 %v885_v45, %s689_s13 }
  0x63   :  { %430 = vrot.lane.b32.xlu1 %v890_v47, %s689_s13 }
  0x64   :  { %428 = vrot.lane.b32.xlu0 %v839_v22, %s689_s13 }
  0x6a   :  { %438 = vrot.lane.b32.xlu2 %v926_v29, %s689_s13 }
  0x6b   :  { %436 = vrot.lane.b32.xlu1 %v939_v34, %s689_s13 }
  0x6c   :  { %434 = vrot.lane.b32.xlu0 %v946_v37, %s689_s13  ;;  %v354_v58 = vpop.permute.xlu2 %353 }
  0x6d   :  { %v396_v27 = vsel %vm342_vm14, -inf, %v354_v58 }
  0x72   :  { %444 = vrot.lane.b32.xlu2 %v971_v15, %s689_s13 }
  0x73   :  { %442 = vrot.lane.b32.xlu1 %v984_v28, %s689_s13 }
  0x74   :  { %440 = vrot.lane.b32.xlu0 %v994_v35, %s689_s13  ;;  %v1129_v32 = vpop.permute.xlu2 %351 }
  0x7a   :  { %450 = vrot.lane.b32.xlu2 %v1030_v36, %s689_s13 }
  0x7b   :  { %448 = vrot.lane.b32.xlu1 %v1043_v60, %s689_s13 }
  0x7c   :  { %446 = vrot.lane.b32.xlu0 %v1046_v61, %s689_s13  ;;  %v360_v56 = vpop.permute.xlu2 %359 }
  0x82   :  { %456 = vrot.lane.b32.xlu2 %v1073_v33, %s689_s13 }
  0x83   :  { %454 = vrot.lane.b32.xlu1 %v1080_v0, %s689_s13 }
  0x84   :  { %452 = vrot.lane.b32.xlu0 %v1083_v42, %s689_s13  ;;  %v366_v5 = vpop.permute.xlu2 %365 }
  0x85   :  { %v348_v6 = vpop.permute.xlu1 %347 }
  0x86   :  { %v346_v59 = vpop.permute.xlu0 %345  ;;  %v393_v14 = vsel %vm342_vm14, -inf, %v348_v6 }
  0x8a   :  { %462 = vrot.lane.b32.xlu2 %v1100_v57, %s689_s13 }
  0x8b   :  { %460 = vrot.lane.b32.xlu1 %v1103_v7, %s689_s13 }
  0x8c   :  { %458 = vrot.lane.b32.xlu0 %v1106_v1, %s689_s13  ;;  %v1140_v30 = vpop.permute.xlu2 %371 }
  0x8d   :  { %v1142_v38 = vpop.permute.xlu1 %349 }
  0x8e   :  { %v1144_v17 = vpop.permute.xlu0 %355 }
  0x94   :  { %v1146_v16 = vpop.permute.xlu2 %377 }
  0x95   :  { %v1148_v3 = vpop.permute.xlu1 %357 }
  0x96   :  { %v344_v26 = vpop.permute.xlu0 %343 }
  0x9c   :  { %v1150_v12 = vpop.permute.xlu2 %383 }
  0x9d   :  { %v1152_v13 = vpop.permute.xlu1 %363 }
  0x9e   :  { %v1154_v4 = vpop.permute.xlu0 %361 }
  0xa4   :  { %v1156_v31 = vpop.permute.xlu2 %389 }
  0xa5   :  { %v1161_v1 = vpop.permute.xlu1 %369 }
  0xa6   :  { %v1163_v7 = vpop.permute.xlu0 %367 }
  0xac   :  { %v421_v41 = vpop.permute.xlu2 %420 }
  0xad   :  { %v466_v42 = vsel %vm415_vm15, -inf, %v421_v41  ;;  %v1171_v0 = vpop.permute.xlu1 %375 }
  0xae   :  { %1430 = vst [vmem:[#allocation21_spill] sm:$0xff] %v1171_v0  ;;  %v490_v46 = vmax.f32 %v393_v14, %v466_v42  ;;  %v1173_v52 = vpop.permute.xlu0 %373 }
  0xb0   :  { %v514_v8 = vmax.f32 %v490_v46, %v791_v50  ;;  %v399_v46 = vsel %vm342_vm14, -inf, %v360_v56 }
  0xb2   :  { %vm538_vm0 = vcmp.eq.f32.partialorder %v514_v8, %v735_v20 }
  0xb3   :  { %v562_v61 = vsel %vm538_vm0, %v735_v20, 0.0 }
  0xb4   :  { %586 = vst [vmem:[#allocation5 + $0x10] sm:$0xff] %v562_v61  ;;  %v427_v60 = vpop.permute.xlu2 %426 }
  0xb5   :  { %v469_v6 = vsel %vm415_vm15, -inf, %v427_v60  ;;  %v1182_v41 = vpop.permute.xlu1 %381 }
  0xb6   :  { %v493_v0 = vmax.f32 %v396_v27, %v469_v6  ;;  %v1184_v14 = vpop.permute.xlu0 %379 }
  0xb8   :  { %v517_v42 = vmax.f32 %v493_v0, %v772_v40  ;;  %v402_v0 = vsel %vm342_vm14, -inf, %v366_v5 }
  0xba   :  { %vm541_vm1 = vcmp.eq.f32.partialorder %v517_v42, %v724_v10 }
  0xbb   :  { %v565_v50 = vsel %vm541_vm1, %v724_v10, 0.0 }
  0xbc   :  { %589 = vst [vmem:[#allocation5 + $0x28] sm:$0xff] %v565_v50  ;;  %v433_v20 = vpop.permute.xlu2 %432 }
  0xbd   :  { %v472_v8 = vsel %vm415_vm15, -inf, %v433_v20  ;;  %v1193_v60 = vpop.permute.xlu1 %387  ;;  %v392_v20 = vsel %vm342_vm14, -inf, %v346_v59 }
  0xbe   :  { %v496_v61 = vmax.f32 %v399_v46, %v472_v8  ;;  %v1195_v27 = vpop.permute.xlu0 %385 }
  0xc0   :  { %v520_v58 = vmax.f32 %v496_v61, %v885_v45  ;;  %v391_v45 = vsel %vm342_vm14, -inf, %v344_v26 }
  0xc2   :  { %vm544_vm2 = vcmp.eq.f32.partialorder %v520_v58, %v784_v48 }
  0xc3   :  { %v568_v40 = vsel %vm544_vm2, %v784_v48, 0.0 }
  0xc4   :  { %592 = vst [vmem:[#allocation5 + $0x40] sm:$0xff] %v568_v40  ;;  %v439_v10 = vpop.permute.xlu2 %438 }
  0xc5   :  { %v475_v56 = vsel %vm415_vm15, -inf, %v439_v10  ;;  %v419_v6 = vpop.permute.xlu1 %418  ;;  %v405_v10 = vsel %vm342_vm14, -inf, %v1140_v30 }
  0xc6   :  { %v499_v42 = vmax.f32 %v402_v0, %v475_v56  ;;  %v417_v50 = vpop.permute.xlu0 %416  ;;  %v465_v48 = vsel %vm415_vm15, -inf, %v419_v6  ;;  %v395_v6 = vsel %vm342_vm14, -inf, %v1129_v32 }
  0xc7   :  { %v464_v46 = vsel %vm415_vm15, -inf, %v417_v50  ;;  %v489_v8 = vmax.f32 %v392_v20, %v465_v48 }
  0xc8   :  { %v523_v5 = vmax.f32 %v499_v42, %v926_v29  ;;  %v488_v61 = vmax.f32 %v391_v45, %v464_v46  ;;  %v394_v42 = vsel %vm342_vm14, -inf, %v1142_v38  ;;  %v408_v46 = vsel %vm342_vm14, -inf, %v1146_v16 }
  0xc9   :  { %v513_v58 = vmax.f32 %v489_v8, %v794_v51 }
  0xca   :  { %vm547_vm3 = vcmp.eq.f32.partialorder %v523_v5, %v836_v18  ;;  %v512_v40 = vmax.f32 %v488_v61, %v899_v55  ;;  %v397_v61 = vsel %vm342_vm14, -inf, %v1144_v17 }
  0xcb   :  { %v571_v59 = vsel %vm547_vm3, %v836_v18, 0.0  ;;  %vm537_vm4 = vcmp.eq.f32.partialorder %v513_v58, %v733_v19  ;;  %v398_v58 = vsel %vm342_vm14, -inf, %v1148_v3 }
  0xcc   :  { %595 = vst [vmem:[#allocation5 + $0x58] sm:$0xff] %v571_v59  ;;  %vm536_vm5 = vcmp.eq.f32.partialorder %v512_v40, %v742_v25  ;;  %v445_v26 = vpop.permute.xlu2 %444  ;;  %v561_v29 = vsel %vm537_vm4, %v733_v19, 0.0 }
  0xcd   :  { %v560_v51 = vsel %vm536_vm5, %v742_v25, 0.0  ;;  %v478_v0 = vsel %vm415_vm15, -inf, %v445_v26  ;;  %585 = vst [vmem:[#allocation5 + $0x8] sm:$0xff] %v561_v29  ;;  %v425_v55 = vpop.permute.xlu1 %424  ;;  %v411_v29 = vsel %vm342_vm14, -inf, %v1150_v12 }
  0xce   :  { %v502_v18 = vmax.f32 %v405_v10, %v478_v0  ;;  %v423_v56 = vpop.permute.xlu0 %422  ;;  %584 = vst [vmem:[#allocation5] sm:$0xff] %v560_v51  ;;  %v468_v19 = vsel %vm415_vm15, -inf, %v425_v55  ;;  %v401_v55 = vsel %vm342_vm14, -inf, %v1152_v13 }
  0xcf   :  { %v467_v25 = vsel %vm415_vm15, -inf, %v423_v56  ;;  %v492_v30 = vmax.f32 %v395_v6, %v468_v19 }
  0xd0   :  { %v526_v50 = vmax.f32 %v502_v18, %v971_v15  ;;  %v491_v20 = vmax.f32 %v394_v42, %v467_v25  ;;  %v400_v18 = vsel %vm342_vm14, -inf, %v1154_v4  ;;  %v414_v25 = vsel %vm342_vm14, -inf, %v1156_v31 }
  0xd1   :  { %v516_v45 = vmax.f32 %v492_v30, %v814_v63 }
  0xd2   :  { %vm550_vm6 = vcmp.eq.f32.partialorder %v526_v50, %v882_v43  ;;  %v515_v32 = vmax.f32 %v491_v20, %v817_v2  ;;  %v404_v20 = vsel %vm342_vm14, -inf, %v1161_v1 }
  0xd3   :  { %v574_v48 = vsel %vm550_vm6, %v882_v43, 0.0  ;;  %vm540_vm7 = vcmp.eq.f32.partialorder %v516_v45, %v722_v9  ;;  %v403_v45 = vsel %vm342_vm14, -inf, %v1163_v7  ;;  %v1431_v7 = vld [vmem:[#allocation8_spill] sm:$0xff] }
  0xd4   :  { %598 = vst [vmem:[#allocation5 + $0x70] sm:$0xff] %v574_v48  ;;  %vm539_vm8 = vcmp.eq.f32.partialorder %v515_v32, %v737_v21  ;;  %v451_v38 = vpop.permute.xlu2 %450  ;;  %v564_v15 = vsel %vm540_vm7, %v722_v9, 0.0 }
  0xd5   :  { %v563_v63 = vsel %vm539_vm8, %v737_v21, 0.0  ;;  %v481_v8 = vsel %vm415_vm15, -inf, %v451_v38  ;;  %588 = vst [vmem:[#allocation5 + $0x20] sm:$0xff] %v564_v15  ;;  %v431_v2 = vpop.permute.xlu1 %430 }
  0xd6   :  { %v505_v43 = vmax.f32 %v408_v46, %v481_v8  ;;  %v429_v5 = vpop.permute.xlu0 %428  ;;  %587 = vst [vmem:[#allocation5 + $0x18] sm:$0xff] %v563_v63  ;;  %v471_v9 = vsel %vm415_vm15, -inf, %v431_v2  ;;  %v1432_v2 = vld [vmem:[#allocation21_spill] sm:$0xff] }
  0xd7   :  { %v470_v21 = vsel %vm415_vm15, -inf, %v429_v5  ;;  %v495_v16 = vmax.f32 %v398_v58, %v471_v9  ;;  %v1434_v9 = vld [vmem:[#allocation15_spill] sm:$0xff] }
  0xd8   :  { %v529_v40 = vmax.f32 %v505_v43, %v1030_v36  ;;  %v494_v59 = vmax.f32 %v397_v61, %v470_v21  ;;  %v1433_v61 = vld [vmem:[#allocation14_spill] sm:$0xff] }
  0xd9   :  { %v519_v26 = vmax.f32 %v495_v16, %v890_v47  ;;  %v1435_v16 = vld [vmem:[#allocation10_spill] sm:$0xff] }
  0xda   :  { %vm553_vm9 = vcmp.eq.f32.partialorder %v529_v40, %v952_v39  ;;  %v518_v17 = vmax.f32 %v494_v59, %v839_v22  ;;  %v1436_v40 = vld [vmem:[#allocation9_spill] sm:$0xff] }
  0xdb   :  { %v577_v10 = vsel %vm553_vm9, %v952_v39, 0.0  ;;  %vm543_vm10 = vcmp.eq.f32.partialorder %v519_v26, %v776_v44 }
  0xdc   :  { %601 = vst [vmem:[#allocation5 + $0x88] sm:$0xff] %v577_v10  ;;  %vm542_vm11 = vcmp.eq.f32.partialorder %v518_v17, %v726_v11  ;;  %v457_v3 = vpop.permute.xlu2 %456  ;;  %v567_v36 = vsel %vm543_vm10, %v776_v44, 0.0  ;;  %v410_v10 = vsel %vm342_vm14, -inf, %v1182_v41  ;;  %v1440_v41 = vld [vmem:[#allocation11_spill] sm:$0xff] }
  0xdd   :  { %v566_v47 = vsel %vm542_vm11, %v726_v11, 0.0  ;;  %v484_v51 = vsel %vm415_vm15, -inf, %v457_v3  ;;  %591 = vst [vmem:[#allocation5 + $0x38] sm:$0xff] %v567_v36  ;;  %v437_v22 = vpop.permute.xlu1 %436  ;;  %v409_v3 = vsel %vm342_vm14, -inf, %v1184_v14 }
  0xde   :  { %v508_v39 = vmax.f32 %v411_v29, %v484_v51  ;;  %v435_v0 = vpop.permute.xlu0 %434  ;;  %590 = vst [vmem:[#allocation5 + $0x30] sm:$0xff] %v566_v47  ;;  %v474_v44 = vsel %vm415_vm15, -inf, %v437_v22  ;;  %v1437_v22 = vld [vmem:[#allocation17_spill] sm:$0xff] }
  0xdf   :  { %v473_v11 = vsel %vm415_vm15, -inf, %v435_v0  ;;  %v498_v12 = vmax.f32 %v401_v55, %v474_v44  ;;  %v1438_v0 = vld [vmem:[#allocation18_spill] sm:$0xff] }
  0xe0   :  { %v532_v56 = vmax.f32 %v508_v39, %v1073_v33  ;;  %v497_v6 = vmax.f32 %v400_v18, %v473_v11  ;;  %v1439_v18 = vld [vmem:[#allocation12_spill] sm:$0xff] }
  0xe1   :  { %v522_v42 = vmax.f32 %v498_v12, %v939_v34 }
  0xe2   :  { %vm556_vm12 = vcmp.eq.f32.partialorder %v532_v56, %v981_v23  ;;  %v521_v13 = vmax.f32 %v497_v6, %v946_v37  ;;  %v413_v56 = vsel %vm342_vm14, -inf, %v1193_v60  ;;  %v412_v6 = vsel %vm342_vm14, -inf, %v1195_v27  ;;  %v1443_v60 = vld [vmem:[#allocation16_spill] sm:$0xff]  ;;  %v1444_v27 = vld [vmem:[#allocation13_spill] sm:$0xff] }
  0xe3   :  { %v580_v19 = vsel %vm556_vm12, %v981_v23, 0.0  ;;  %vm546_vm13 = vcmp.eq.f32.partialorder %v522_v42, %v845_v24 }
  0xe4   :  { %604 = vst [vmem:[#allocation5 + $0xa0] sm:$0xff] %v580_v19  ;;  %vm545_vm0 = vcmp.eq.f32.partialorder %v521_v13, %v786_v49  ;;  %v463_v4 = vpop.permute.xlu2 %462  ;;  %v570_v33 = vsel %vm546_vm13, %v845_v24, 0.0 }
  0xe5   :  { %v569_v34 = vsel %vm545_vm0, %v786_v49, 0.0  ;;  %v487_v30 = vsel %vm415_vm15, -inf, %v463_v4  ;;  %594 = vst [vmem:[#allocation5 + $0x50] sm:$0xff] %v570_v33  ;;  %v443_v37 = vpop.permute.xlu1 %442 }
  0xe6   :  { %v511_v23 = vmax.f32 %v414_v25, %v487_v30  ;;  %v441_v50 = vpop.permute.xlu0 %440  ;;  %593 = vst [vmem:[#allocation5 + $0x48] sm:$0xff] %v569_v34  ;;  %v477_v24 = vsel %vm415_vm15, -inf, %v443_v37  ;;  %v1441_v25 = vld [vmem:[#allocation19_spill] sm:$0xff]  ;;  %v1442_v34 = vld [vmem:[#allocation20_spill] sm:$0xff] }
  0xe7   :  { %v476_v49 = vsel %vm415_vm15, -inf, %v441_v50  ;;  %v501_v31 = vmax.f32 %v404_v20, %v477_v24 }
  0xe8   :  { %v535_v32 = vmax.f32 %v511_v23, %v1100_v57  ;;  %v500_v48 = vmax.f32 %v403_v45, %v476_v49 }
  0xe9   :  { %v525_v38 = vmax.f32 %v501_v31, %v984_v28  ;;  %v407_v28 = vsel %vm342_vm14, -inf, %v1432_v2 }
  0xea   :  { %vm559_vm1 = vcmp.eq.f32.partialorder %v535_v32, %v811_v62  ;;  %v524_v1 = vmax.f32 %v500_v48, %v994_v35 }
  0xeb   :  { %v583_v46 = vsel %vm559_vm1, %v811_v62, 0.0  ;;  %vm549_vm2 = vcmp.eq.f32.partialorder %v525_v38, %v896_v54  ;;  %v406_v62 = vsel %vm342_vm14, -inf, %v1173_v52 }
  0xec   :  { %607 = vst [vmem:[#allocation5 + $0xb8] sm:$0xff] %v583_v46  ;;  %vm548_vm3 = vcmp.eq.f32.partialorder %v524_v1, %v1431_v7  ;;  %v573_v15 = vsel %vm549_vm2, %v896_v54, 0.0 }
  0xed   :  { %v572_v63 = vsel %vm548_vm3, %v1431_v7, 0.0  ;;  %597 = vst [vmem:[#allocation5 + $0x68] sm:$0xff] %v573_v15  ;;  %v449_v57 = vpop.permute.xlu1 %448 }
  0xee   :  { %v447_v8 = vpop.permute.xlu0 %446  ;;  %596 = vst [vmem:[#allocation5 + $0x60] sm:$0xff] %v572_v63  ;;  %v480_v35 = vsel %vm415_vm15, -inf, %v449_v57 }
  0xef   :  { %v479_v54 = vsel %vm415_vm15, -inf, %v447_v8  ;;  %v504_v43 = vmax.f32 %v407_v28, %v480_v35 }
  0xf0   :  { %v503_v5 = vmax.f32 %v406_v62, %v479_v54 }
  0xf1   :  { %v528_v58 = vmax.f32 %v504_v43, %v1433_v61 }
  0xf2   :  { %v527_v21 = vmax.f32 %v503_v5, %v1434_v9 }
  0xf3   :  { %vm552_vm4 = vcmp.eq.f32.partialorder %v528_v58, %v1435_v16 }
  0xf4   :  { %vm551_vm5 = vcmp.eq.f32.partialorder %v527_v21, %v1436_v40  ;;  %v576_v59 = vsel %vm552_vm4, %v1435_v16, 0.0 }
  0xf5   :  { %v575_v52 = vsel %vm551_vm5, %v1436_v40, 0.0  ;;  %600 = vst [vmem:[#allocation5 + $0x80] sm:$0xff] %v576_v59  ;;  %v455_v26 = vpop.permute.xlu1 %454 }
  0xf6   :  { %v453_v17 = vpop.permute.xlu0 %452  ;;  %599 = vst [vmem:[#allocation5 + $0x78] sm:$0xff] %v575_v52  ;;  %v483_v29 = vsel %vm415_vm15, -inf, %v455_v26 }
  0xf7   :  { %v482_v36 = vsel %vm415_vm15, -inf, %v453_v17  ;;  %v507_v47 = vmax.f32 %v410_v10, %v483_v29 }
  0xf8   :  { %v506_v51 = vmax.f32 %v409_v3, %v482_v36 }
  0xf9   :  { %v531_v39 = vmax.f32 %v507_v47, %v1437_v22 }
  0xfa   :  { %v530_v55 = vmax.f32 %v506_v51, %v1438_v0 }
  0xfb   :  { %vm555_vm6 = vcmp.eq.f32.partialorder %v531_v39, %v1439_v18 }
  0xfc   :  { %vm554_vm7 = vcmp.eq.f32.partialorder %v530_v55, %v1440_v41  ;;  %v579_v44 = vsel %vm555_vm6, %v1439_v18, 0.0 }
  0xfd   :  { %v578_v14 = vsel %vm554_vm7, %v1440_v41, 0.0  ;;  %603 = vst [vmem:[#allocation5 + $0x98] sm:$0xff] %v579_v44  ;;  %v461_v11 = vpop.permute.xlu1 %460 }
  0xfe   :  { %v459_v12 = vpop.permute.xlu0 %458  ;;  %602 = vst [vmem:[#allocation5 + $0x90] sm:$0xff] %v578_v14  ;;  %v486_v42 = vsel %vm415_vm15, -inf, %v461_v11 }
  0xff   :  { %v485_v13 = vsel %vm415_vm15, -inf, %v459_v12  ;;  %v510_v19 = vmax.f32 %v413_v56, %v486_v42 }
 0x100   :  { %v509_v4 = vmax.f32 %v412_v6, %v485_v13 }
 0x101   :  { %v534_v33 = vmax.f32 %v510_v19, %v1441_v25 }
 0x102   :  { %v533_v30 = vmax.f32 %v509_v4, %v1442_v34 }
 0x103   :  { %vm558_vm14 = vcmp.eq.f32.partialorder %v534_v33, %v1443_v60 }
 0x104   :  { %vm557_vm8 = vcmp.eq.f32.partialorder %v533_v30, %v1444_v27  ;;  %v582_v37 = vsel %vm558_vm14, %v1443_v60, 0.0 }
 0x105   :  { %v581_v53 = vsel %vm557_vm8, %v1444_v27, 0.0  ;;  %606 = vst [vmem:[#allocation5 + $0xb0] sm:$0xff] %v582_v37 }
 0x106   :  { %605 = vst [vmem:[#allocation5 + $0xa8] sm:$0xff] %v581_v53 }
 0x107   :  { %620 = dma.vmem_to_hbm [thread:$0]  %s613_s15, 3072, %s615_s18, [#allocation4], %s686_s11, %s686_s11, %s687_s12  }
 0x108   :  { %683 = dma.done.wait [#allocation4], 3072  }
 0x109   :  { %684 = vsyncadd [#allocation4], 4294964224 }
 0x10a   :  { %625 = vsyncpa [#allocation3], 1 }
 0x10b   :  { %626 = vsyncpa [#allocation4], 1 }

</bundles_post_ra>
